<compile_context>
chip_gen: v7x
topology: tpu7x:2x2x1
jax: 0.10.0
libtpu: 0.0.40
codegen_flags: <defaults>
</compile_context>

<pallas_src>
import math

import jax
import jax.numpy as jnp
from jax import lax
from jax.experimental import pallas as pl
from jax.experimental.pallas import tpu as pltpu


def _make_kernel(TB, T, D):
    """Kernel processing TB batch elements (TB*T rows) per grid step."""

    def kernel(x_ref, w_ref, b_ref, ctx_ref, attn_ref):
        x = x_ref[...]                                   # (TB*T, D), input dtype
        w = w_ref[...]                                   # (D, 3D),  input dtype
        b = b_ref[...].astype(jnp.float32)               # (1, 3D)

        # Single fused QKV projection on the MXU (f32 accumulation).
        qkv = jnp.dot(x, w, preferred_element_type=jnp.float32) + b  # (TB*T, 3D)

        in_dtype = x.dtype
        q = qkv[:, 0 * D:1 * D].astype(in_dtype).reshape(TB, T, D)
        k = qkv[:, 1 * D:2 * D].astype(in_dtype).reshape(TB, T, D)
        v = qkv[:, 2 * D:3 * D].astype(in_dtype).reshape(TB, T, D)

        # scores[b] = Q[b] @ K[b]^T  (scale already folded into Wq/bq).
        scores = lax.dot_general(
            q, k,
            dimension_numbers=(((2,), (2,)), ((0,), (0,))),
            preferred_element_type=jnp.float32)          # (TB, T, T)

        # Numerically stable softmax along the last dim.
        m = jnp.max(scores, axis=-1, keepdims=True)
        e = jnp.exp(scores - m)
        denom = jnp.sum(e, axis=-1, keepdims=True)
        attn = e * pl.reciprocal(denom, approx=True)     # (TB, T, T), f32

        # ctx[b] = attn[b] @ V[b]
        ctx = lax.dot_general(
            attn.astype(in_dtype), v,
            dimension_numbers=(((2,), (1,)), ((0,), (0,))),
            preferred_element_type=jnp.float32)          # (TB, T, D)

        ctx_ref[...] = ctx.reshape(TB * T, D).astype(ctx_ref.dtype)
        attn_ref[...] = attn.reshape(TB * T, T).astype(attn_ref.dtype)

    return kernel


def _pick_tb(B, T, target_rows=256):
    """Batch elements per grid step: fill ~target_rows MXU rows, keep grid>=2."""
    tb = max(1, min(B, target_rows // max(T, 1)))
    while B % tb != 0:
        tb -= 1
    # Prefer a grid of length >= 2 so both TensorCores get work on v7x.
    if B // tb < 2 and B >= 2:
        tb = max(1, tb // 2)
        while B % tb != 0:
            tb -= 1
    # (8,128) rule: block sublane extent must be a multiple of 8 or full.
    if (tb * T) % 8 != 0 and tb != B:
        tb = B
    return tb


def temporal_attention(x, wq, bq, wk, bk, wv, bv):
    """x: (B, T, D). Weights in PyTorch layout (D_out, D_in); biases (D,)."""
    B, T, D = x.shape
    dtype = x.dtype
    scale = 1.0 / math.sqrt(float(D))

    # Fused, pre-transposed QKV weight (D_in, 3*D_out); softmax scale folded
    # into the Q slice (weights AND bias) so the kernel never scales scores.
    w_qkv = jnp.concatenate(
        [wq.T.astype(dtype) * jnp.asarray(scale, dtype),
         wk.T.astype(dtype),
         wv.T.astype(dtype)], axis=1)                          # (D, 3D)
    b_qkv = jnp.concatenate(
        [bq.astype(dtype) * jnp.asarray(scale, dtype),
         bk.astype(dtype),
         bv.astype(dtype)]).reshape(1, 3 * D)                  # (1, 3D)

    TB = _pick_tb(B, T)
    G = B // TB
    R = TB * T

    # Present x / outputs as 2-D slabs so stores are lane/sublane dense.
    x2 = x.reshape(B * T, D)

    ctx2, attn2 = pl.pallas_call(
        _make_kernel(TB, T, D),
        out_shape=(
            jax.ShapeDtypeStruct((B * T, D), dtype),           # context slab
            jax.ShapeDtypeStruct((B * T, T), dtype),           # attention slab
        ),
        grid_spec=pltpu.PrefetchScalarGridSpec(
            num_scalar_prefetch=0,
            grid=(G,),
            in_specs=[
                pl.BlockSpec((R, D), lambda g: (g, 0)),        # x rows
                pl.BlockSpec((D, 3 * D), lambda g: (0, 0)),    # fused W (resident)
                pl.BlockSpec((1, 3 * D), lambda g: (0, 0)),    # fused b (resident)
            ],
            out_specs=[
                pl.BlockSpec((R, D), lambda g: (g, 0)),
                pl.BlockSpec((R, T), lambda g: (g, 0)),
            ],
        ),
        compiler_params=pltpu.CompilerParams(
            dimension_semantics=("parallel",),
            vmem_limit_bytes=32 * 1024 * 1024),
    )(x2, w_qkv, b_qkv)

    return ctx2.reshape(B, T, D), attn2.reshape(B, T, T)


def _reference(x, wq, bq, wk, bk, wv, bv):
    # Pure-JAX reference mirroring the PyTorch forward.
    q = jnp.einsum('btd,od->bto', x, wq) + bq
    k = jnp.einsum('btd,od->bto', x, wk) + bk
    v = jnp.einsum('btd,od->bto', x, wv) + bv
    scores = jnp.einsum('btd,bsd->bts', q, k) / math.sqrt(x.shape[-1])
    attn = jax.nn.softmax(scores, axis=-1)
    ctx = jnp.einsum('bts,bsd->btd', attn, v)
    return ctx, attn


if __name__ == "__main__":
    B, T, D = 2, 8, 32  # batch, sequence length, input_size

    key = jax.random.PRNGKey(0)
    k_x, k_wq, k_bq, k_wk, k_bk, k_wv, k_bv = jax.random.split(key, 7)

    x = jax.random.normal(k_x, (B, T, D), dtype=jnp.float32)

    # nn.Linear(input_size, input_size)-style params (deterministic init).
    bound = 1.0 / math.sqrt(D)
    wq = jax.random.uniform(k_wq, (D, D), jnp.float32, -bound, bound)
    bq = jax.random.uniform(k_bq, (D,), jnp.float32, -bound, bound)
    wk = jax.random.uniform(k_wk, (D, D), jnp.float32, -bound, bound)
    bk = jax.random.uniform(k_bk, (D,), jnp.float32, -bound, bound)
    wv = jax.random.uniform(k_wv, (D, D), jnp.float32, -bound, bound)
    bv = jax.random.uniform(k_bv, (D,), jnp.float32, -bound, bound)

    ctx, attn = temporal_attention(x, wq, bq, wk, bk, wv, bv)
    jax.block_until_ready((ctx, attn))

    ctx_ref, attn_ref = _reference(x, wq, bq, wk, bk, wv, bv)
    # Tolerance loosened slightly: approx (EUP) reciprocal in the softmax denom.
    assert jnp.allclose(ctx, ctx_ref, atol=2e-3, rtol=2e-3), "context mismatch"
    assert jnp.allclose(attn, attn_ref, atol=2e-3, rtol=2e-3), "attn mismatch"

    print("KERNEL_OK")
</pallas_src>

<mosaic_0001>
module attributes {stable_mosaic.version = 11 : i64} {
  func.func @kernel(%arg0: i32, %arg1: memref<8x32xf32, #tpu.memory_space<vmem>>, %arg2: memref<32x96xf32, #tpu.memory_space<vmem>>, %arg3: memref<1x96xf32, #tpu.memory_space<vmem>>, %arg4: memref<8x32xf32, #tpu.memory_space<vmem>>, %arg5: memref<8x8xf32, #tpu.memory_space<vmem>>) attributes {dimension_semantics = [#tpu.dimension_semantics<parallel>], iteration_bounds = array<i64: 2>, scalar_prefetch = 0 : i64, scratch_operands = 0 : i64, tpu.core_type = #tpu.core_type<tc>, window_params = [{transform_indices = @transform_0, window_bounds = array<i64: 8, 32>}, {pipeline_mode = #tpu.pipeline_mode<synchronous>, transform_indices = @transform_1, window_bounds = array<i64: 32, 96>}, {pipeline_mode = #tpu.pipeline_mode<synchronous>, transform_indices = @transform_2, window_bounds = array<i64: 1, 96>}, {transform_indices = @transform_3, window_bounds = array<i64: 8, 32>}, {transform_indices = @transform_4, window_bounds = array<i64: 8, 8>}]} {
    %c0 = arith.constant 0 : index
    %c0_0 = arith.constant 0 : index
    %0 = vector.load %arg1[%c0, %c0_0] : memref<8x32xf32, #tpu.memory_space<vmem>>, vector<8x32xf32>
    %c0_1 = arith.constant 0 : index
    %c0_2 = arith.constant 0 : index
    %1 = vector.load %arg2[%c0_1, %c0_2] : memref<32x96xf32, #tpu.memory_space<vmem>>, vector<32x96xf32>
    %c0_3 = arith.constant 0 : index
    %c0_4 = arith.constant 0 : index
    %2 = vector.load %arg3[%c0_3, %c0_4] : memref<1x96xf32, #tpu.memory_space<vmem>>, vector<1x96xf32>
    %cst = arith.constant dense<0.000000e+00> : vector<8x96xf32>
    %3 = tpu.matmul %0, %1, %cst {dimension_numbers = #tpu.dot_dimension_numbers<[1], [0], [0], [1], [0, 0, 1, 1], [], []>} : vector<8x32xf32>, vector<32x96xf32>, vector<8x96xf32> -> vector<8x96xf32>
    %4 = vector.broadcast %2 : vector<1x96xf32> to vector<8x96xf32>
    %5 = arith.addf %3, %4 : vector<8x96xf32>
    %6 = vector.extract_strided_slice %5 {offsets = [0, 0], sizes = [8, 32], strides = [1, 1]} : vector<8x96xf32> to vector<8x32xf32>
    %7 = vector.shape_cast %6 : vector<8x32xf32> to vector<1x8x32xf32>
    %8 = vector.extract_strided_slice %5 {offsets = [0, 32], sizes = [8, 32], strides = [1, 1]} : vector<8x96xf32> to vector<8x32xf32>
    %9 = vector.shape_cast %8 : vector<8x32xf32> to vector<1x8x32xf32>
    %10 = vector.extract_strided_slice %5 {offsets = [0, 64], sizes = [8, 32], strides = [1, 1]} : vector<8x96xf32> to vector<8x32xf32>
    %11 = vector.shape_cast %10 : vector<8x32xf32> to vector<1x8x32xf32>
    %cst_5 = arith.constant dense<0.000000e+00> : vector<1x8x8xf32>
    %12 = tpu.matmul %7, %9, %cst_5 {dimension_numbers = #tpu.dot_dimension_numbers<[2], [2], [1], [1], [0, 0, 0, 1, 1, 1], [0], [0]>} : vector<1x8x32xf32>, vector<1x8x32xf32>, vector<1x8x8xf32> -> vector<1x8x8xf32>
    %cst_6 = arith.constant dense<0xFF800000> : vector<1x8xf32>
    %13 = vector.multi_reduction <maximumf>, %12, %cst_6 [2] : vector<1x8x8xf32> to vector<1x8xf32>
    %14 = vector.shape_cast %13 : vector<1x8xf32> to vector<1x8x1xf32>
    %15 = vector.broadcast %14 : vector<1x8x1xf32> to vector<1x8x8xf32>
    %16 = arith.subf %12, %15 : vector<1x8x8xf32>
    %17 = math.exp %16 : vector<1x8x8xf32>
    %cst_7 = arith.constant dense<0.000000e+00> : vector<1x8xf32>
    %18 = vector.multi_reduction <add>, %17, %cst_7 [2] : vector<1x8x8xf32> to vector<1x8xf32>
    %19 = vector.shape_cast %18 : vector<1x8xf32> to vector<1x8x1xf32>
    %20 = tpu.reciprocal %19 {approx = true} : vector<1x8x1xf32> -> vector<1x8x1xf32>
    %21 = vector.broadcast %20 : vector<1x8x1xf32> to vector<1x8x8xf32>
    %22 = arith.mulf %17, %21 : vector<1x8x8xf32>
    %cst_8 = arith.constant dense<0.000000e+00> : vector<1x8x32xf32>
    %23 = tpu.matmul %22, %11, %cst_8 {dimension_numbers = #tpu.dot_dimension_numbers<[2], [1], [1], [2], [0, 0, 0, 1, 1, 2], [0], [0]>} : vector<1x8x8xf32>, vector<1x8x32xf32>, vector<1x8x32xf32> -> vector<1x8x32xf32>
    %24 = vector.shape_cast %23 : vector<1x8x32xf32> to vector<8x32xf32>
    %c0_9 = arith.constant 0 : index
    %c0_10 = arith.constant 0 : index
    %25 = vector.load %arg4[%c0_9, %c0_10] : memref<8x32xf32, #tpu.memory_space<vmem>>, vector<8x32xf32>
    tpu.vector_store %arg4[%c0_9, %c0_10], %24 {strides = array<i32>} : memref<8x32xf32, #tpu.memory_space<vmem>>, vector<8x32xf32>,
    %26 = vector.shape_cast %22 : vector<1x8x8xf32> to vector<8x8xf32>
    %c0_11 = arith.constant 0 : index
    %c0_12 = arith.constant 0 : index
    %27 = vector.load %arg5[%c0_11, %c0_12] : memref<8x8xf32, #tpu.memory_space<vmem>>, vector<8x8xf32>
    tpu.vector_store %arg5[%c0_11, %c0_12], %26 {strides = array<i32>} : memref<8x8xf32, #tpu.memory_space<vmem>>, vector<8x8xf32>,
    return
  }
  func.func @transform_0(%arg0: i32) -> (i32, i32) {
    %c0_i32 = arith.constant 0 : i32
    %c0_i32_0 = arith.constant 0 : i32
    return %arg0, %c0_i32 : i32, i32
  }
  func.func @transform_1(%arg0: i32) -> (i32, i32) {
    %c0_i32 = arith.constant 0 : i32
    %c0_i32_0 = arith.constant 0 : i32
    %c0_i32_1 = arith.constant 0 : i32
    return %c0_i32, %c0_i32_0 : i32, i32
  }
  func.func @transform_2(%arg0: i32) -> (i32, i32) {
    %c0_i32 = arith.constant 0 : i32
    %c0_i32_0 = arith.constant 0 : i32
    %c0_i32_1 = arith.constant 0 : i32
    return %c0_i32, %c0_i32_0 : i32, i32
  }
  func.func @transform_3(%arg0: i32) -> (i32, i32) {
    %c0_i32 = arith.constant 0 : i32
    %c0_i32_0 = arith.constant 0 : i32
    return %arg0, %c0_i32 : i32, i32
  }
  func.func @transform_4(%arg0: i32) -> (i32, i32) {
    %c0_i32 = arith.constant 0 : i32
    %c0_i32_0 = arith.constant 0 : i32
    return %arg0, %c0_i32 : i32, i32
  }
}

</mosaic_0001>

<bundles_post_ra>
// kernel: tpu_custom_call.1
= control target key start
LH: loop header
LB: loop body
LE: loop exit
PB: predicated region body
PF: predicated region fallthrough
CT: control target
= control target key end

     0   :  { %10 = vsyncpa [#allocation3], 0  ;;  %s1125_s0 = inlined_call_operand.hbm [shape: f32[16,32], index: 0, kind: input, shape index: {}]   ;;  %s1126_s1 = inlined_call_operand.hbm [shape: f32[32,96], index: 1, kind: input, shape index: {}]   ;;  %s1127_s2 = inlined_call_operand.vmem [shape: f32[1,96], index: 2, kind: input, shape index: {}]   ;;  %s1128_s3 = inlined_call_operand.hbm [shape: f32[16,32], index: 3, kind: output, shape index: {0}]   ;;  %s1129_s4 = inlined_call_operand.vmem [shape: f32[16,8], index: 4, kind: output, shape index: {1}]  }
   0x1   :  { %12 = vsyncpa [#allocation3 + $0x1], 0 }
   0x2   :  { %13 = vsyncpa [#allocation6], 0 }
   0x3   :  { %14 = vsyncpa [#allocation4], 0 }
   0x4   :  { %16 = vsyncpa [#allocation4 + $0x1], 0  ;;  %s906_s15 = smov 0   ;;  %s908_s16 = smov 0  }
   0x5   :  { %s910_s17 = smov 0   ;;  %s912_s18 = smov 0  }
   0x6 LB: > { %s927_s19 = sadd.s32 4294967295, %s869_s18   ;;  %s617_s20 = sadd.s32 4294967294, %s869_s18   ;;  %s869_s18 = sphi %s912_s18, %s1149_s18   ;;  %s865_s17 = sphi %s910_s17, %s1148_s17   ;;  %s861_s16 = sphi %s908_s16, %s1147_s16   ;;  %s857_s15 = sphi %s906_s15, %s1146_s15  }
   0x7   : > { %p42_p0 = scmp.ne.s32.totalorder %s861_s16, %s857_s15  ;;  %p1130_p1 = scmp.eq.s32.totalorder %s927_s19, 0 }
   0x8   : > { %p114_p3 = scmp.eq.s32.totalorder %s617_s20, 1  ;;  %p618_p5 = scmp.ge.s32.totalorder %s869_s18, 1 }
   0x9   : > { %p936_p4 = por %p1130_p1, %p42_p0  ;;  %p147_p7 = scmp.lt.s32.totalorder %s869_s18, 3 }
   0xa   : > { %p941_p6 = por %p114_p3, %p42_p0  ;;  %s871_s24 = smov [#allocation5]  }
   0xb   : > { %s1133_s21 = scalar_select %p936_p4, 1, 0 }
   0xc   : > { %s1134_s22 = scalar_select %p941_p6, 1, 0 }
   0xd   : > { %p946_p8 = pnand %p618_p5, %p147_p7  ;;  %s159_s25 = sshll.u32 %s871_s24, 4  ;;  %s950_s25 = int_to_ptr.vmem [resolvable:$true] %s159_s25 }
   0xe   : > { %s962_s27 = sadd.s32 1, %s869_s18   ;;  %s29_s28 = sadd.s32 1, %s865_s17 }
   0xf   : > { %s1135_s23 = scalar_select %p946_p8, 1, 0 }
  0x10   : > { %p681_p9 = pneg %p946_p8  ;;  %s26_s29 = ssub.s32 %s869_s18, %s962_s27 }
  0x11   : > { %s741_s6 = scalar_lea.hbm %s1126_s1, 512 }
  0x12   : > { %p957_p11 = pnand %p681_p9, %p1130_p1  ;;  %p742_p12 = scmp.ne.s32.totalorder %s1126_s1, %s741_s6 }
  0x13   : > { %p748_p5 = scmp.lt.u32.totalorder %s741_s6, %s1126_s1 }
  0x14   : > { %p743_p13 = pneg %p957_p11 }
  0x16   : > { %p744_p0 = pnand %p743_p13, %p742_p12 }
  0x18   : > { %p745_p3 = pneg %p744_p0 }
  0x1a   : > { %p750_p7 = pnand %p748_p5, %p745_p3 }
  0x1c   : > { %753 = shalt.err (!%p750_p7)
}
  0x1d   : > { %s754_s11 = scalar_lea.vmem %s950_s25, 512  ;;  %p762_p2 = scmp.lt.s32.totalorder %s950_s25, %s950_s25 }
  0x1e   : > { %p755_p9 = scmp.ne.s32.totalorder %s950_s25, %s754_s11  ;;  %p763_p6 = scmp.lt.s32.totalorder %s754_s11, %s754_s11 }
  0x20   : > { %p757_p10 = pnand %p755_p9, %p743_p13  ;;  %p764_p4 = por %p763_p6, %p762_p2 }
  0x22   : > { %p758_p1 = pneg %p757_p10 }
  0x24   : > { %p765_p8 = pnand %p764_p4, %p758_p1 }
  0x26   : > { %768 = shalt.err (!%p765_p8)
}
  0x27   : > { %s872_s12 = smov 128   ;;  %s873_s13 = smov 8  }
  0x28   : > { %684 = dma.hbm_to_vmem [thread:$0]  (!%p957_p11), %s1126_s1, 512, %s950_s25, [#allocation6], %s872_s12, %s872_s12, %s873_s13  }
  0x29   : > { %p27_p2 = scmp.eq.s32.totalorder %s26_s29, 0  ;;  %p36_p1 = scmp.ne.s32.totalorder %s865_s17, %s861_s16 }
  0x2a   : > { %p37_p4 = scmp.eq.s32.totalorder %s869_s18, 0  ;;  %p694_p6 = scmp.lt.s32.totalorder %s869_s18, 2 }
  0x2b   : > { %s993_s24 = scalar_select %p27_p2, %s865_s17, %s29_s28  }
  0x2c   : > { %p38_p8 = por %p37_p4, %p36_p1  ;;  %p1137_p10 = scmp.eq.s32.totalorder %s927_s19, 1 }
  0x2d   : > { %s176_s5 = sand.u32 1, %s865_s17   ;;  %s622_s6 = sshll.u32 %s869_s18, 7 }
  0x2e   : > { %p997_p12 = por %p1137_p10, %p36_p1  ;;  %s621_s7 = sshll.u32 %s176_s5, 3 }
  0x2f   : > { %s1006_s9 = scalar_lea.hbm %s1125_s0, %s622_s6  ;;  %s180_s25 = scalar_lea.vmem [#allocation2], %s621_s7 }
  0x30   : > { %s187_s28 = sshll.u32 %s180_s25, 4  ;;  %p1008_p11 = pnand %p694_p6, %p38_p8  ;;  %s1012_s28 = int_to_ptr.vmem [resolvable:$true] %s187_s28 }
  0x31   : > { %s177_s10 = scalar_lea.sflag [#allocation3], %s176_s5  ;;  %s769_s11 = scalar_lea.hbm %s1006_s9, 128 }
  0x32   : > { %p770_p13 = scmp.ne.s32.totalorder %s1006_s9, %s769_s11  ;;  %p771_p0 = pneg %p1008_p11 }
  0x33   : > { %s774_s14 = scalar_lea.hbm %s1125_s0, 256  ;;  %p775_p7 = scmp.lt.u32.totalorder %s1006_s9, %s1125_s0 }
  0x34   : > { %p772_p3 = pnand %p771_p0, %p770_p13  ;;  %p776_p9 = scmp.lt.u32.totalorder %s774_s14, %s769_s11 }
  0x35   : > { %p778_p1 = scmp.lt.u32.totalorder %s769_s11, %s1006_s9 }
  0x36   : > { %p773_p5 = pneg %p772_p3  ;;  %p777_p2 = por %p776_p9, %p775_p7 }
  0x38   : > { %p779_p4 = por %p778_p1, %p777_p2 }
  0x3a   : > { %p780_p6 = pnand %p779_p4, %p773_p5 }
  0x3c   : > { %783 = shalt.err (!%p780_p6)
}
  0x3d   : > { %s784_s5 = scalar_lea.vmem %s1012_s28, 128  ;;  %s874_s7 = smov [#allocation2]  }
  0x3e   : > { %p785_p8 = scmp.ne.s32.totalorder %s1012_s28, %s784_s5  ;;  %s789_s26 = sshll.u32 %s874_s7, 4  ;;  %s790_s26 = int_to_ptr.vmem [resolvable:$false] %s789_s26 }
  0x3f   : > { %s791_s8 = scalar_lea.vmem %s790_s26, 256  ;;  %p792_p3 = scmp.lt.s32.totalorder %s1012_s28, %s790_s26 }
  0x40   : > { %p787_p10 = pnand %p785_p8, %p771_p0  ;;  %p793_p7 = scmp.lt.s32.totalorder %s791_s8, %s784_s5 }
  0x42   : > { %p788_p13 = pneg %p787_p10  ;;  %p794_p9 = por %p793_p7, %p792_p3 }
  0x44   : > { %p795_p2 = pnand %p794_p9, %p788_p13 }
  0x46   : > { %798 = shalt.err (!%p795_p2)
}
  0x47   : > { %688 = dma.hbm_to_vmem [thread:$0]  (!%p1008_p11), %s1006_s9, 128, %s1012_s28, %s177_s10  }
  0x48   : > { %p1140_p5 = scmp.ne.s32.totalorder %s1135_s23, 0 }
  0x49   : > { %s1042_s25 = sand.u32 (!%p1140_p5), 1, %s861_s16   ;;  %p1141_p0 = scmp.ne.s32.totalorder (!%p1140_p5), %s1133_s21, 0 }
  0x4a   : > { %196 = sbr.rel (%p1140_p5) target bundleno = 1179 (0x49b), region = 32  ;;  %s624_s11 = sshll.u32 (!%p1140_p5), %s1042_s25, 3 }
  0x4b   : > { %s199_s12 = scalar_lea.sflag (!%p1140_p5), [#allocation3], %s1042_s25  ;;  %s202_s13 = scalar_lea.vmem (!%p1140_p5), [#allocation2], %s624_s11 }
  0x51   : > { %844 = dma.done.wait (%p1141_p0), %s199_s12, 128  }
  0x52   : > { %846 = vsyncadd (%p1141_p0), %s199_s12, 4294967168  ;;  %p1142_p11 = scmp.eq.s32.totalorder %s927_s19, 0 }
  0x54   : > { %848 = dma.done.wait (%p1142_p11), [#allocation6], 512   ;;  %p1143_p1 = pmov %p1142_p11 }
  0x55   : > { %v875_v0 = vmov 0.0|0.0   ;;  %vm876_vm0 = vmmov 0   ;;  %v877_v1 = vmov 0.0   ;;  %v240_v2 = vld [vmem:[#allocation5] sm:$0xff]  ;;  %v241_v3 = vld [vmem:[#allocation5 + $0x8] sm:$0xff]  ;;  %v242_v4 = vld [vmem:[#allocation5 + $0x10] sm:$0xff] }
  0x56   : > { %850 = vsyncadd (%p1143_p1), [#allocation6], 4294966784  ;;  %667 = vmatprep.subr.bf16.mxu0 %v875_v0  ;;  %654 = vmatprep.mubr.msk.f32.mxu0 %vm876_vm0, %v877_v1  ;;  %v668_v5 = vpack.c.bf16 %v241_v3, %v240_v2  ;;  %v243_v6 = vld [vmem:[#allocation5 + $0x18] sm:$0xff]  ;;  %vm251_vm1 = vcmask 261120   ;;  %v628_v9 = vld [vmem:[%s1127_s2] ss:$0 sm:$0xff] }
  0x57   : > { %657 = vmatprep.subr.mxu1 %v877_v1  ;;  %659 = vmatprep.mubr.msk.f32.mxu1 %vm876_vm0, %v877_v1  ;;  %v671_v7 = vpack.c.bf16 %v243_v6, %v242_v4  ;;  %v239_v8 = vld [vmem:[%s202_s13] sm:$0xff]  ;;  %s878_s9 = smov 96   ;;  %vm402_vm2 = vcmask 64512   ;;  %s879_s28 = smov 64  }
  0x58   : > { %669 = vmatpush3.bf16.msra.mxu0 %v668_v5  ;;  %p235_p4 = scmp.lt.s32.totalorder %s927_s19, 1  ;;  %s634_s5 = sshll.u32 %s927_s19, 7 }
  0x59   : > { %670 = vmatprep.subr.bf16.mxu0 %v875_v0  ;;  %s228_s7 = scalar_lea.vmem [#allocation7], %s624_s11  ;;  %s1080_s13 = scalar_lea.hbm %s1128_s3, %s634_s5 }
  0x5a   : > { %s236_s29 = scalar_select %p235_p4, %s927_s19, 1 }
  0x5b   : > { %s510_s26 = sshll.u32 %s228_s7, 4  ;;  %s493_s21 = scalar_lea.sflag [#allocation4], %s1042_s25  ;;  %s1082_s26 = int_to_ptr.vmem [resolvable:$true] %s510_s26 }
  0x5c   : > { %672 = vmatpush3.bf16.msra.mxu0 %v671_v7  ;;  %s627_s10 = sshll.u32 %s236_s29, 3  ;;  %s799_s23 = scalar_lea.vmem %s1082_s26, 128 }
  0x5d   : > { %s238_s6 = scalar_lea.vmem %s1129_s4, %s627_s10  ;;  %p800_p6 = scmp.ne.s32.totalorder %s1082_s26, %s799_s23 }
  0x5e   : > { %s880_s19 = smov [#allocation7]  }
  0x5f   : > { %655 = vmatmul.mubr.msk.f32.vlgmr.msra.gmra.mrb[0].mxu0 %vm251_vm1, %v239_v8  ;;  %p801_p8 = pnand %p800_p6, %p997_p12  ;;  %s803_s11 = sshll.u32 %s880_s19, 4  ;;  %s804_s11 = int_to_ptr.vmem [resolvable:$false] %s803_s11 }
  0x60   : > { %p806_p13 = scmp.lt.s32.totalorder %s1082_s26, %s804_s11 }
  0x61   : > { %p802_p10 = pneg %p801_p8 }
 0x132   : > { %v321_v10 = vpop.f32.mrb[0].mxu0 }
 0x133   : > { %v322_v11 = vadd.f32 %v628_v9, %v321_v10  ;;  %v656_v12 = vpop.f32.mrb[1].mxu0 }
 0x135   : > { %326 = vrot.lane.b32.xlu0 %v322_v11, %s878_s9  ;;  %s805_s9 = scalar_lea.vmem %s804_s11, 256 }
 0x136   : > { %p807_p3 = scmp.lt.s32.totalorder %s805_s9, %s799_s23 }
 0x138   : > { %p808_p7 = por %p807_p3, %p806_p13 }
 0x13a   : > { %p809_p9 = pnand %p808_p7, %p802_p10 }
 0x1a7   : > { %v327_v13 = vpop.permute.xlu0 %326 }
 0x1a8   : > { %658 = vmatpush3.xpose.msk.msra.mxu1 %vm251_vm1, %v327_v13 }
 0x1a9   : > { %662 = vmatprep.subr.mxu1 %v877_v1 }
 0x1ab   : > { %660 = vmatmul.mubr.msk.f32.vlgmr.msra.gmra.mrb[0].mxu1 %vm251_vm1, %v322_v11 }
 0x1ac   : > { %664 = vmatprep.mubr.msk.f32.mxu1 %vm876_vm0, %v877_v1 }
 0x27e   : > { %v398_v14 = vpop.f32.mrb[0].mxu1 }
 0x27f   : > { %v661_v15 = vpop.f32.mrb[1].mxu1  ;;  %v403_v16 = vsel %vm402_vm2, %v398_v14, -inf }
 0x280   : > { %404 = vmax.xlane.f32.xlu0 %v403_v16 }
 0x30d   : > { %v405_v17 = vpop.xlane.xlu0 %404 }
 0x30e   : > { %v406_v18 = vsub.f32 %v398_v14, %v405_v17 }
 0x310   : > { %v407_v19 = vmul.f32 1.442695, %v406_v18 }
 0x312   : > { %737 = vpow2.f32 %v407_v19 }
 0x31c   : > { %v738_v20 = vpop.eup %737 }
 0x31d   : > { %v409_v21 = vsel %vm402_vm2, %v738_v20, 0.0 }
 0x31e   : > { %410 = vadd.xlane.f32.xlu1 %v409_v21 }
 0x32f   : > { %414 = vrot.lane.b32.xlu1 %v322_v11, %s879_s28 }
 0x3ab   : > { %v411_v22 = vpop.xlane.xlu1 %410 }
 0x3ac   : > { %739 = vrcp.f32 %v411_v22 }
 0x3af   : > { %v415_v23 = vpop.permute.xlu1 %414 }
 0x3b0   : > { %663 = vmatpush3.msra.mxu1 %v415_v23 }
 0x3b6   : > { %v740_v24 = vpop.eup %739 }
 0x3b7   : > { %v413_v25 = vmul.f32 %v740_v24, %v738_v20 }
 0x3b9   : > { %491 = vst.msk [vmem:[%s238_s6] sm:$0xff] %vm402_vm2, %v413_v25  ;;  %665 = vmatmul.mubr.msk.f32.vlgmr.msra.gmra.mrb[2].mxu1 %vm402_vm2, %v413_v25 }
 0x48c   : > { %v486_v26 = vpop.f32.mrb[2].mxu1 }
 0x48d   : > { %490 = vst.msk [vmem:[%s228_s7] sm:$0xff] %vm251_vm1, %v486_v26  ;;  %v666_v27 = vpop.f32.mrb[3].mxu1 }
 0x48e   : > { %812 = shalt.err (!%p809_p9)
}
 0x48f   : > { %s813_s25 = scalar_lea.hbm %s1080_s13, 128  ;;  %s817_s10 = scalar_lea.hbm %s1128_s3, 256 }
 0x490   : > { %p814_p2 = scmp.ne.s32.totalorder %s1080_s13, %s813_s25  ;;  %p818_p11 = scmp.lt.u32.totalorder %s1080_s13, %s1128_s3 }
 0x491   : > { %p819_p1 = scmp.lt.u32.totalorder %s817_s10, %s813_s25  ;;  %p821_p6 = scmp.lt.u32.totalorder %s813_s25, %s1080_s13 }
 0x492   : > { %p815_p5 = pnand %p814_p2, %p997_p12 }
 0x493   : > { %p820_p4 = por %p819_p1, %p818_p11 }
 0x494   : > { %p816_p0 = pneg %p815_p5 }
 0x495   : > { %p822_p8 = por %p821_p6, %p820_p4 }
 0x497   : > { %p823_p10 = pnand %p822_p8, %p816_p0 }
 0x499   : > { %826 = shalt.err (!%p823_p10)
}
 0x49a   : > { %679 = dma.vmem_to_hbm [thread:$0]  (%p997_p12), %s1082_s26, 128, %s1080_s13, %s493_s21  }
 0x49b PF: > { %s525_s6 = sand.u32 1, %s857_s15   ;;  %p1144_p13 = scmp.ne.s32.totalorder %s1134_s22, 0 }
 0x49c   : > { %p1145_p3 = scmp.ge.s32.totalorder %s869_s18, 2  ;;  %s526_s5 = scalar_lea.sflag [#allocation4], %s525_s6 }
 0x49e   : > { %p690_p7 = pnand %p1145_p3, %p1144_p13 }
 0x4a0   : > { %852 = dma.done.wait (!%p690_p7), %s526_s5, 128  }
 0x4a1   : > { %854 = vsyncadd (!%p690_p7), %s526_s5, 4294967168  ;;  %p19_p9 = scmp.ge.s32.totalorder %s962_s27, 4   ;;  %s1146_s15 = smov %s861_s16 }
 0x4a2   : > { %s1147_s16 = smov %s865_s17  ;;  %s1148_s17 = smov %s993_s24 }
 0x4a3   : > { %s1149_s18 = smov %s962_s27  ;;  %21 = sbr.rel (!%p19_p9) target bundleno = 6 (0x6), region = 93 }
 0x4aa   :  { %538 = vsyncpa [#allocation3], 1 }
 0x4ab   :  { %540 = vsyncpa [#allocation3 + $0x1], 1 }
 0x4ac   :  { %541 = vsyncpa [#allocation6], 1 }
 0x4ad   :  { %542 = vsyncpa [#allocation4], 1 }
 0x4ae   :  { %544 = vsyncpa [#allocation4 + $0x1], 1 }

</bundles_post_ra>
